<compile_context>
chip_gen: v5e
topology: v5e:2x2
jax: 0.10.0
libtpu: 0.0.40
codegen_flags: <defaults>
</compile_context>

<pallas_src>
from dataclasses import dataclass

import jax
import jax.numpy as jnp
from jax.experimental import pallas as pl
from jax.experimental.pallas import tpu as pltpu


@dataclass
class AttentionState:
    """Mirror of the reference AttentionState dataclass."""
    focus_level: float = 0.0
    emotional_coherence: float = 0.0
    memory_influence: float = 0.0
    narrative_alignment: float = 0.0
    adaptation_rate: float = 0.0


# ---------------------------------------------------------------------------
# Kernels
# ---------------------------------------------------------------------------

def _attention_kernel(x_ref, wq_ref, bq_ref, wk_ref, bk_ref, wv_ref, bv_ref, out_ref):
    """Base path: QKV projections + (Q @ K^T) @ V, fused, one batch element."""
    x = x_ref[...].astype(jnp.float32)                                              # (S, H)
    q = jnp.dot(x, wq_ref[...], preferred_element_type=jnp.float32) + bq_ref[...]   # (S, A)
    k = jnp.dot(x, wk_ref[...], preferred_element_type=jnp.float32) + bk_ref[...]   # (S, A)
    v = jnp.dot(x, wv_ref[...], preferred_element_type=jnp.float32) + bv_ref[...]   # (S, H)
    w = jnp.dot(q, k.T, preferred_element_type=jnp.float32)                         # (S, S)
    out_ref[...] = jnp.dot(w, v, preferred_element_type=jnp.float32).astype(out_ref.dtype)


def _memory_attention_kernel(x_ref, sp_ref, wq_ref, bq_ref, wk_ref, bk_ref, wv_ref, bv_ref,
                             wg1x_ref, wg1m_ref, bg1_ref, wg2_ref, bg2_ref, out_ref):
    """Memory-gated path: base attention weights scaled by the memory gate."""
    x = x_ref[...].astype(jnp.float32)                                              # (S, H)
    sp = sp_ref[...].astype(jnp.float32)                                            # (S, H)
    q = jnp.dot(x, wq_ref[...], preferred_element_type=jnp.float32) + bq_ref[...]   # (S, A)
    k = jnp.dot(x, wk_ref[...], preferred_element_type=jnp.float32) + bk_ref[...]   # (S, A)
    v = jnp.dot(x, wv_ref[...], preferred_element_type=jnp.float32) + bv_ref[...]   # (S, H)

    # memory_gate: Linear(2H->H) with the concat replaced by split weight halves,
    # GELU, then Linear(H->1) computed as a VPU multiply + row-reduce (no N=1 MXU
    # matmul), Sigmoid.
    # TODO(synk): PyTorch nn.GELU default is exact (erf); tanh-approx is used here
    # for a guaranteed EUP lowering — numeric delta is ~1e-3 at most.
    h = (jnp.dot(x, wg1x_ref[...], preferred_element_type=jnp.float32)
         + jnp.dot(sp, wg1m_ref[...], preferred_element_type=jnp.float32)
         + bg1_ref[...])                                                             # (S, H)
    h = jax.nn.gelu(h, approximate=True)
    gate_logit = jnp.sum(h * wg2_ref[...], axis=-1, keepdims=True) + bg2_ref[0, 0]   # (S, 1)
    gate = jax.nn.sigmoid(gate_logit)

    w = jnp.dot(q, k.T, preferred_element_type=jnp.float32) * gate                   # (S, S)
    out_ref[...] = jnp.dot(w, v, preferred_element_type=jnp.float32).astype(out_ref.dtype)


# ---------------------------------------------------------------------------
# Jitted wrappers (no host syncs)
# ---------------------------------------------------------------------------

@jax.jit
def _base_attention_call(query, wq, bq, wk, bk, wv, bv):
    B, S, H = query.shape
    A = wq.shape[1]
    return pl.pallas_call(
        _attention_kernel,
        out_shape=jax.ShapeDtypeStruct((B, S, H), query.dtype),
        grid=(B,),
        in_specs=[
            pl.BlockSpec((None, S, H), lambda b: (b, 0, 0)),   # query (per batch)
            pl.BlockSpec((H, A), lambda b: (0, 0)),            # Wq   (resident)
            pl.BlockSpec((1, A), lambda b: (0, 0)),            # bq
            pl.BlockSpec((H, A), lambda b: (0, 0)),            # Wk
            pl.BlockSpec((1, A), lambda b: (0, 0)),            # bk
            pl.BlockSpec((H, H), lambda b: (0, 0)),            # Wv
            pl.BlockSpec((1, H), lambda b: (0, 0)),            # bv
        ],
        out_specs=pl.BlockSpec((None, S, H), lambda b: (b, 0, 0)),
        compiler_params=pltpu.CompilerParams(dimension_semantics=("parallel",)),
    )(query, wq, bq, wk, bk, wv, bv)


@jax.jit
def _memory_attention_call(query, stable_patterns, wq, bq, wk, bk, wv, bv, wg1, bg1, wg2, bg2):
    B, S, H = query.shape
    A = wq.shape[1]
    # Layout plumbing outside the kernel: split the (2H, H) gate weight into the
    # query half and the memory half (avoids an in-kernel concat), lay the (H, 1)
    # gate weight out as a lane-dense (1, H) row, keep its bias as an SMEM scalar.
    wg1x = wg1[:H]
    wg1m = wg1[H:]
    wg2_row = wg2.reshape(1, H)
    bg2_s = bg2.reshape(1, 1)
    return pl.pallas_call(
        _memory_attention_kernel,
        out_shape=jax.ShapeDtypeStruct((B, S, H), query.dtype),
        grid=(B,),
        in_specs=[
            pl.BlockSpec((None, S, H), lambda b: (b, 0, 0)),            # query
            pl.BlockSpec((None, S, H), lambda b: (b, 0, 0)),            # stable_patterns
            pl.BlockSpec((H, A), lambda b: (0, 0)),                     # Wq
            pl.BlockSpec((1, A), lambda b: (0, 0)),                     # bq
            pl.BlockSpec((H, A), lambda b: (0, 0)),                     # Wk
            pl.BlockSpec((1, A), lambda b: (0, 0)),                     # bk
            pl.BlockSpec((H, H), lambda b: (0, 0)),                     # Wv
            pl.BlockSpec((1, H), lambda b: (0, 0)),                     # bv
            pl.BlockSpec((H, H), lambda b: (0, 0)),                     # Wg1 (query half)
            pl.BlockSpec((H, H), lambda b: (0, 0)),                     # Wg1 (memory half)
            pl.BlockSpec((1, H), lambda b: (0, 0)),                     # bg1
            pl.BlockSpec((1, H), lambda b: (0, 0)),                     # Wg2 as (1, H) row
            pl.BlockSpec(memory_space=pltpu.MemorySpace.SMEM),          # bg2 scalar
        ],
        out_specs=pl.BlockSpec((None, S, H), lambda b: (b, 0, 0)),
        compiler_params=pltpu.CompilerParams(dimension_semantics=("parallel",)),
    )(query, stable_patterns, wq, bq, wk, bk, wv, bv, wg1x, wg1m, bg1, wg2_row, bg2_s)


def consciousness_attention_forward(query, params, memory_context=None,
                                    narrative_state=None, emotional_context=None):
    """Pallas-backed ConsciousnessAttention.forward.

    Returns (attention_output, AttentionState), matching the reference module.
    """
    # TODO(synk): _integrate_narrative, _modulate_attention and _update_state are
    # referenced but not defined in the reference module; the narrative_state /
    # emotional_context branches are therefore no-ops and the returned state keeps
    # its default values.
    del narrative_state, emotional_context
    if memory_context is not None:
        out = _memory_attention_call(
            query, memory_context["stable_patterns"],
            params["wq"], params["bq"], params["wk"], params["bk"],
            params["wv"], params["bv"], params["wg1"], params["bg1"],
            params["wg2"], params["bg2"])
    else:
        out = _base_attention_call(
            query, params["wq"], params["bq"], params["wk"], params["bk"],
            params["wv"], params["bv"])
    return out, AttentionState()


# ---------------------------------------------------------------------------
# Demo / self-check
# ---------------------------------------------------------------------------

def _init_linear(key, fan_in, fan_out):
    """nn.Linear-style init: U(-1/sqrt(fan_in), 1/sqrt(fan_in))."""
    kw, kb = jax.random.split(key)
    bound = 1.0 / jnp.sqrt(fan_in)
    w = jax.random.uniform(kw, (fan_in, fan_out), jnp.float32, -bound, bound)
    b = jax.random.uniform(kb, (1, fan_out), jnp.float32, -bound, bound)
    return w, b


if __name__ == "__main__":
    # config: hidden_size=32, attention_dims=16; query is (batch, seq, hidden)
    B, S, H, A = 2, 8, 32, 16

    key = jax.random.PRNGKey(0)
    kx, ksp, k1, k2, k3, k4, k5 = jax.random.split(key, 7)

    query = jax.random.normal(kx, (B, S, H), jnp.float32)
    stable_patterns = jax.random.normal(ksp, (B, S, H), jnp.float32)

    wq, bq = _init_linear(k1, H, A)
    wk, bk = _init_linear(k2, H, A)
    wv, bv = _init_linear(k3, H, H)
    wg1, bg1 = _init_linear(k4, 2 * H, H)
    wg2, bg2 = _init_linear(k5, H, 1)

    params = dict(wq=wq, bq=bq, wk=wk, bk=bk, wv=wv, bv=bv,
                  wg1=wg1, bg1=bg1, wg2=wg2, bg2=bg2)

    # ---- base path (no optional contexts) ----
    out, state = consciousness_attention_forward(query, params)
    out = jax.block_until_ready(out)

    q_ref = query @ wq + bq
    k_ref = query @ wk + bk
    v_ref = query @ wv + bv
    w_ref = jnp.einsum("bsa,bta->bst", q_ref, k_ref)
    base_ref = jnp.einsum("bst,bth->bsh", w_ref, v_ref)
    assert out.shape == (B, S, H)
    assert jnp.allclose(out, base_ref, atol=1e-4, rtol=1e-4), "base path mismatch"

    # ---- memory-gated path ----
    out_m, state_m = consciousness_attention_forward(
        query, params, memory_context={"stable_patterns": stable_patterns})
    out_m = jax.block_until_ready(out_m)

    gate_h = jax.nn.gelu(jnp.concatenate([query, stable_patterns], -1) @ wg1 + bg1,
                         approximate=True)
    gate_ref = jax.nn.sigmoid(gate_h @ wg2 + bg2)
    mem_ref = jnp.einsum("bst,bth->bsh", w_ref * gate_ref, v_ref)
    assert jnp.allclose(out_m, mem_ref, atol=1e-4, rtol=1e-4), "memory path mismatch"

    assert isinstance(state, AttentionState) and isinstance(state_m, AttentionState)
    print("KERNEL_OK")
</pallas_src>

<mosaic_0001>
module attributes {stable_mosaic.version = 11 : i64} {
  func.func @_attention_kernel(%arg0: i32, %arg1: memref<1x8x32xf32, #tpu.memory_space<vmem>>, %arg2: memref<32x16xf32, #tpu.memory_space<vmem>>, %arg3: memref<1x16xf32, #tpu.memory_space<vmem>>, %arg4: memref<32x16xf32, #tpu.memory_space<vmem>>, %arg5: memref<1x16xf32, #tpu.memory_space<vmem>>, %arg6: memref<32x32xf32, #tpu.memory_space<vmem>>, %arg7: memref<1x32xf32, #tpu.memory_space<vmem>>, %arg8: memref<1x8x32xf32, #tpu.memory_space<vmem>>) attributes {dimension_semantics = [#tpu.dimension_semantics<parallel>], iteration_bounds = array<i64: 2>, scalar_prefetch = 0 : i64, scratch_operands = 0 : i64, tpu.core_type = #tpu.core_type<tc>, window_params = [{transform_indices = @transform_0, window_bounds = array<i64: 1, 8, 32>}, {pipeline_mode = #tpu.pipeline_mode<synchronous>, transform_indices = @transform_1, window_bounds = array<i64: 32, 16>}, {pipeline_mode = #tpu.pipeline_mode<synchronous>, transform_indices = @transform_2, window_bounds = array<i64: 1, 16>}, {pipeline_mode = #tpu.pipeline_mode<synchronous>, transform_indices = @transform_3, window_bounds = array<i64: 32, 16>}, {pipeline_mode = #tpu.pipeline_mode<synchronous>, transform_indices = @transform_4, window_bounds = array<i64: 1, 16>}, {pipeline_mode = #tpu.pipeline_mode<synchronous>, transform_indices = @transform_5, window_bounds = array<i64: 32, 32>}, {pipeline_mode = #tpu.pipeline_mode<synchronous>, transform_indices = @transform_6, window_bounds = array<i64: 1, 32>}, {transform_indices = @transform_7, window_bounds = array<i64: 1, 8, 32>}]} {
    %c0 = arith.constant 0 : index
    %c0_0 = arith.constant 0 : index
    %c0_1 = arith.constant 0 : index
    %0 = vector.load %arg1[%c0, %c0_0, %c0_1] : memref<1x8x32xf32, #tpu.memory_space<vmem>>, vector<1x8x32xf32>
    %1 = vector.shape_cast %0 : vector<1x8x32xf32> to vector<8x32xf32>
    %c0_2 = arith.constant 0 : index
    %c0_3 = arith.constant 0 : index
    %2 = vector.load %arg2[%c0_2, %c0_3] : memref<32x16xf32, #tpu.memory_space<vmem>>, vector<32x16xf32>
    %cst = arith.constant dense<0.000000e+00> : vector<8x16xf32>
    %3 = tpu.matmul %1, %2, %cst {dimension_numbers = #tpu.dot_dimension_numbers<[1], [0], [0], [1], [0, 0, 1, 1], [], []>} : vector<8x32xf32>, vector<32x16xf32>, vector<8x16xf32> -> vector<8x16xf32>
    %c0_4 = arith.constant 0 : index
    %c0_5 = arith.constant 0 : index
    %4 = vector.load %arg3[%c0_4, %c0_5] : memref<1x16xf32, #tpu.memory_space<vmem>>, vector<1x16xf32>
    %5 = vector.broadcast %4 : vector<1x16xf32> to vector<8x16xf32>
    %6 = arith.addf %3, %5 : vector<8x16xf32>
    %c0_6 = arith.constant 0 : index
    %c0_7 = arith.constant 0 : index
    %7 = vector.load %arg4[%c0_6, %c0_7] : memref<32x16xf32, #tpu.memory_space<vmem>>, vector<32x16xf32>
    %cst_8 = arith.constant dense<0.000000e+00> : vector<8x16xf32>
    %8 = tpu.matmul %1, %7, %cst_8 {dimension_numbers = #tpu.dot_dimension_numbers<[1], [0], [0], [1], [0, 0, 1, 1], [], []>} : vector<8x32xf32>, vector<32x16xf32>, vector<8x16xf32> -> vector<8x16xf32>
    %c0_9 = arith.constant 0 : index
    %c0_10 = arith.constant 0 : index
    %9 = vector.load %arg5[%c0_9, %c0_10] : memref<1x16xf32, #tpu.memory_space<vmem>>, vector<1x16xf32>
    %10 = vector.broadcast %9 : vector<1x16xf32> to vector<8x16xf32>
    %11 = arith.addf %8, %10 : vector<8x16xf32>
    %c0_11 = arith.constant 0 : index
    %c0_12 = arith.constant 0 : index
    %12 = vector.load %arg6[%c0_11, %c0_12] : memref<32x32xf32, #tpu.memory_space<vmem>>, vector<32x32xf32>
    %cst_13 = arith.constant dense<0.000000e+00> : vector<8x32xf32>
    %13 = tpu.matmul %1, %12, %cst_13 {dimension_numbers = #tpu.dot_dimension_numbers<[1], [0], [0], [1], [0, 0, 1, 1], [], []>} : vector<8x32xf32>, vector<32x32xf32>, vector<8x32xf32> -> vector<8x32xf32>
    %c0_14 = arith.constant 0 : index
    %c0_15 = arith.constant 0 : index
    %14 = vector.load %arg7[%c0_14, %c0_15] : memref<1x32xf32, #tpu.memory_space<vmem>>, vector<1x32xf32>
    %15 = vector.broadcast %14 : vector<1x32xf32> to vector<8x32xf32>
    %16 = arith.addf %13, %15 : vector<8x32xf32>
    %17 = tpu.transpose %11, [1, 0] : vector<8x16xf32> -> vector<16x8xf32>
    %cst_16 = arith.constant dense<0.000000e+00> : vector<8x8xf32>
    %18 = tpu.matmul %6, %17, %cst_16 {dimension_numbers = #tpu.dot_dimension_numbers<[1], [0], [0], [1], [0, 0, 1, 1], [], []>} : vector<8x16xf32>, vector<16x8xf32>, vector<8x8xf32> -> vector<8x8xf32>
    %cst_17 = arith.constant dense<0.000000e+00> : vector<8x32xf32>
    %19 = tpu.matmul %18, %16, %cst_17 {dimension_numbers = #tpu.dot_dimension_numbers<[1], [0], [0], [1], [0, 0, 1, 1], [], []>} : vector<8x8xf32>, vector<8x32xf32>, vector<8x32xf32> -> vector<8x32xf32>
    %c0_18 = arith.constant 0 : index
    %c0_19 = arith.constant 0 : index
    %c0_20 = arith.constant 0 : index
    %20 = vector.load %arg8[%c0_18, %c0_19, %c0_20] : memref<1x8x32xf32, #tpu.memory_space<vmem>>, vector<1x8x32xf32>
    %21 = vector.shape_cast %20 : vector<1x8x32xf32> to vector<8x32xf32>
    %22 = vector.shape_cast %19 : vector<8x32xf32> to vector<1x8x32xf32>
    tpu.vector_store %arg8[%c0_18, %c0_19, %c0_20], %22 {strides = array<i32>} : memref<1x8x32xf32, #tpu.memory_space<vmem>>, vector<1x8x32xf32>,
    return
  }
  func.func @transform_0(%arg0: i32) -> (i32, i32, i32) {
    %c0_i32 = arith.constant 0 : i32
    %c0_i32_0 = arith.constant 0 : i32
    %c0_i32_1 = arith.constant 0 : i32
    return %arg0, %c0_i32, %c0_i32_0 : i32, i32, i32
  }
  func.func @transform_1(%arg0: i32) -> (i32, i32) {
    %c0_i32 = arith.constant 0 : i32
    %c0_i32_0 = arith.constant 0 : i32
    %c0_i32_1 = arith.constant 0 : i32
    return %c0_i32, %c0_i32_0 : i32, i32
  }
  func.func @transform_2(%arg0: i32) -> (i32, i32) {
    %c0_i32 = arith.constant 0 : i32
    %c0_i32_0 = arith.constant 0 : i32
    %c0_i32_1 = arith.constant 0 : i32
    return %c0_i32, %c0_i32_0 : i32, i32
  }
  func.func @transform_3(%arg0: i32) -> (i32, i32) {
    %c0_i32 = arith.constant 0 : i32
    %c0_i32_0 = arith.constant 0 : i32
    %c0_i32_1 = arith.constant 0 : i32
    return %c0_i32, %c0_i32_0 : i32, i32
  }
  func.func @transform_4(%arg0: i32) -> (i32, i32) {
    %c0_i32 = arith.constant 0 : i32
    %c0_i32_0 = arith.constant 0 : i32
    %c0_i32_1 = arith.constant 0 : i32
    return %c0_i32, %c0_i32_0 : i32, i32
  }
  func.func @transform_5(%arg0: i32) -> (i32, i32) {
    %c0_i32 = arith.constant 0 : i32
    %c0_i32_0 = arith.constant 0 : i32
    %c0_i32_1 = arith.constant 0 : i32
    return %c0_i32, %c0_i32_0 : i32, i32
  }
  func.func @transform_6(%arg0: i32) -> (i32, i32) {
    %c0_i32 = arith.constant 0 : i32
    %c0_i32_0 = arith.constant 0 : i32
    %c0_i32_1 = arith.constant 0 : i32
    return %c0_i32, %c0_i32_0 : i32, i32
  }
  func.func @transform_7(%arg0: i32) -> (i32, i32, i32) {
    %c0_i32 = arith.constant 0 : i32
    %c0_i32_0 = arith.constant 0 : i32
    %c0_i32_1 = arith.constant 0 : i32
    return %arg0, %c0_i32, %c0_i32_0 : i32, i32, i32
  }
}

</mosaic_0001>

<bundles_post_ra>
// kernel: _base_attention_call.1
= control target key start
LH: loop header
LB: loop body
LE: loop exit
PB: predicated region body
PF: predicated region fallthrough
CT: control target
= control target key end

     0   :  { %12 = vsyncpa [#allocation3], 0  ;;  %s786_s0 = inlined_call_operand.vmem [shape: f32[2,8,32], index: 0, kind: input, shape index: {}]   ;;  %s787_s1 = inlined_call_operand.vmem [shape: f32[32,16], index: 1, kind: input, shape index: {}]   ;;  %s788_s2 = inlined_call_operand.vmem [shape: f32[1,16], index: 2, kind: input, shape index: {}]   ;;  %s789_s3 = inlined_call_operand.vmem [shape: f32[32,16], index: 3, kind: input, shape index: {}]   ;;  %s790_s4 = inlined_call_operand.vmem [shape: f32[1,16], index: 4, kind: input, shape index: {}]   ;;  %s791_s5 = inlined_call_operand.vmem [shape: f32[32,32], index: 5, kind: input, shape index: {}]   ;;  %s792_s6 = inlined_call_operand.vmem [shape: f32[1,32], index: 6, kind: input, shape index: {}]   ;;  %s793_s7 = inlined_call_operand.hbm [shape: f32[2,8,32], index: 7, kind: output, shape index: {}]  }
   0x1   :  { %14 = vsyncpa [#allocation3 + $0x1], 0  ;;  %s652_s24 = smov 0   ;;  %s654_s25 = smov 0  }
   0x2   :  { %s656_s26 = smov 0   ;;  %s658_s27 = smov 0  }
   0x3 LB: > { %s673_s28 = sadd.s32 4294967295, %s610_s27   ;;  %s490_s29 = sadd.s32 4294967294, %s610_s27   ;;  %s610_s27 = sphi %s658_s27, %s799_s27   ;;  %s606_s26 = sphi %s656_s26, %s798_s26   ;;  %s602_s25 = sphi %s654_s25, %s797_s25   ;;  %s598_s24 = sphi %s652_s24, %s796_s24  }
   0x4   : > { %s677_s30 = sadd.s32 1, %s610_s27   ;;  %s179_s8 = sadd.s32 1, %s606_s26 }
   0x5   : > { %s176_s9 = ssub.s32 %s610_s27, %s677_s30  ;;  %p189_p0 = scmp.ne.s32.totalorder %s606_s26, %s602_s25 }
   0x6   : > { %p177_p1 = scmp.eq.s32.totalorder %s176_s9, 0  ;;  %p190_p2 = scmp.eq.s32.totalorder %s673_s28, 1 }
   0x7   : > { %p195_p3 = scmp.ne.s32.totalorder %s602_s25, %s598_s24  ;;  %p196_p4 = scmp.eq.s32.totalorder %s490_s29, 1 }
   0x8   : > { %s688_s10 = scalar_select %p177_p1, %s606_s26, %s179_s8  }
   0x9   : > { %p690_p5 = por %p190_p2, %p189_p0  ;;  %p694_p6 = por %p196_p4, %p195_p3 }
   0xa   : > { %p493_p7 = scmp.ge.s32.totalorder %s610_s27, 1  ;;  %p239_p8 = scmp.lt.s32.totalorder %s610_s27, 3 }
   0xc   : > { %p240_p9 = pnand %p493_p7, %p239_p8 }
   0xd   : > { %p270_p10 = scmp.lt.s32.totalorder (!%p240_p9), %s673_s28, 1  ;;  %s267_s20 = sand.u32 (!%p240_p9), 1, %s602_s25  }
   0xe   : > { %243 = sbr.rel (%p240_p9) target bundleno = 425 (0x1a9), region = 48  ;;  %s494_s21 = sshll.u32 (!%p240_p9), %s267_s20, 3 }
   0xf   : > { %s503_s22 = sshll.u32 (!%p240_p9), %s673_s28, 3  ;;  %s416_s15 = scalar_lea.sflag (!%p240_p9), [#allocation3], %s267_s20 }
  0x10   : > { %s426_s9 = scalar_lea.hbm (!%p240_p9), %s793_s7, %s503_s22  ;;  %s568_s19 = scalar_lea.hbm (!%p240_p9), %s793_s7, 16 }
  0x11   : > { %s430_s14 = sshll.u32 (!%p240_p9), %s426_s9, 4  ;;  %s431_s14 = int_to_ptr.hbm [resolvable:$true] %s430_s14 }
  0x12   : > { %s562_s16 = sshra.s32 (!%p240_p9), %s431_s14, 4  ;;  %s563_s16 = int_to_ptr.hbm [resolvable:$true] %s562_s16 }
  0x13   : > { %v310_v0 = vld [vmem:[%s789_s3 + $0x18] sm:$0xff]  ;;  %v309_v1 = vld [vmem:[%s789_s3 + $0x10] sm:$0xff]  ;;  %v308_v4 = vld [vmem:[%s789_s3 + $0x8] sm:$0xff]  ;;  %s271_s8 = scalar_select %p270_p10, %s673_s28, 1  ;;  %vm283_vm0 = vcmask 261120   ;;  %vm363_vm1 = vcmask 130048  }
  0x14   : > { %v278_v2 = vld [vmem:[%s787_s1 + $0x18] sm:$0xff]  ;;  %327 = vmatpush.msra.mxu1 %v310_v0  ;;  %v277_v3 = vld [vmem:[%s787_s1 + $0x10] sm:$0xff]  ;;  %v276_v5 = vld [vmem:[%s787_s1 + $0x8] sm:$0xff]  ;;  %vm390_vm2 = vcmask 64512   ;;  %s564_s17 = scalar_lea.hbm %s563_s16, 8  ;;  %p569_p0 = scmp.lt.s32.totalorder %s563_s16, %s793_s7 }
  0x15   : > { %299 = vmatpush.msra.mxu0 %v278_v2  ;;  %v338_v6 = vld [vmem:[%s791_s5 + $0x18] sm:$0xff]  ;;  %v337_v7 = vld [vmem:[%s791_s5 + $0x10] sm:$0xff]  ;;  %v307_v8 = vld [vmem:[%s789_s3] sm:$0xff]  ;;  %s495_s18 = sshll.u32 %s271_s8, 3  ;;  %s269_s8 = scalar_lea.vmem [#allocation2], %s494_s21 }
  0x16   : > { %328 = vmatpush.msra.mxu1 %v309_v1  ;;  %v275_v9 = vld [vmem:[%s787_s1] sm:$0xff]  ;;  %355 = vmatpush.msra.mxu2 %v338_v6  ;;  %s273_s23 = scalar_lea.vmem %s786_s0, %s495_s18  ;;  %v336_v11 = vld [vmem:[%s791_s5 + $0x8] sm:$0xff]  ;;  %s428_s13 = sshll.u32 %s269_s8, 4  ;;  %s429_s13 = int_to_ptr.vmem [resolvable:$true] %s428_s13 }
  0x17   : > { %300 = vmatpush.msra.mxu0 %v277_v3  ;;  %v274_v10 = vld [vmem:[%s273_s23] sm:$0xff]  ;;  %p565_p11 = scmp.ne.s32.totalorder %s563_s16, %s564_s17  ;;  %p570_p1 = scmp.lt.s32.totalorder %s568_s19, %s564_s17 }
  0x18   : > { %329 = vmatpush.msra.mxu1 %v308_v4  ;;  %356 = vmatpush.msra.mxu2 %v337_v7  ;;  %v335_v12 = vld [vmem:[%s791_s5] sm:$0xff] }
  0x19   : > { %301 = vmatpush.msra.mxu0 %v276_v5  ;;  %v545_v13 = vld [vmem:[%s790_s4] ss:$0 sm:$0xff]  ;;  %p566_p12 = pnand %p565_p11, %p690_p5  ;;  %p571_p2 = por %p570_p1, %p569_p0 }
  0x1a   : > { %330 = vmatpush.msra.mxu1 %v307_v8  ;;  %357 = vmatpush.msra.mxu2 %v336_v11  ;;  %v546_v14 = vld [vmem:[%s788_s2] ss:$0 sm:$0xff] }
  0x1b   : > { %302 = vmatpush.msra.mxu0 %v275_v9  ;;  %497 = vmatmul.msk.f32.vlgmr.msra.gmra.mxu1 %vm283_vm0, %v274_v10  ;;  %v547_v19 = vld [vmem:[%s792_s6] ss:$0 sm:$0xff]  ;;  %p567_p13 = pneg %p566_p12 }
  0x1c   : > { %496 = vmatmul.msk.f32.vlgmr.msra.gmra.mxu0 %vm283_vm0, %v274_v10  ;;  %358 = vmatpush.msra.mxu2 %v335_v12 }
  0x1d   : > { %498 = vmatmul.msk.f32.vlgmr.msra.gmra.mxu2 %vm283_vm0, %v274_v10  ;;  %p572_p3 = pnand %p571_p2, %p567_p13 }
  0x98   : > { %v332_v15 = vpop.f32.mrf.mxu1 }
  0x99   : > { %v304_v16 = vpop.f32.mrf.mxu0  ;;  %v333_v17 = vadd.f32 %v545_v13, %v332_v15 }
  0x9a   : > { %v305_v18 = vadd.f32 %v546_v14, %v304_v16 }
  0x9b   : > { %499 = vmatpush.xpose.msk.msra.mxu3 %vm363_vm1, %v333_v17 }
  0x9e   : > { %500 = vmatmul.msk.f32.vlgmr.msra.gmra.mxu3 %vm363_vm1, %v305_v18 }
  0xa0   : > { %v360_v20 = vpop.f32.mrf.mxu2 }
  0xa1   : > { %v361_v21 = vadd.f32 %v547_v19, %v360_v20 }
  0xa3   : > { %409 = vmatpush.msrb.mxu3 %v361_v21 }
 0x121   : > { %v387_v22 = vpop.f32.mrf.mxu3 }
 0x122   : > { %501 = vmatmul.msk.f32.vlgmr.msrb.gmra.mxu3 %vm390_vm2, %v387_v22 }
 0x1a5   : > { %v411_v23 = vpop.f32.mrf.mxu3 }
 0x1a6   : > { %414 = vst.msk [vmem:[%s269_s8] sm:$0xff] %vm283_vm0, %v411_v23 }
 0x1a7   : > { %575 = shalt.err (!%p572_p3)
}
 0x1a8   : > { %506 = dma.vmem_to_hbm [thread:$0]  (%p690_p5), %s429_s13, 128, %s431_s14, %s416_s15  }
 0x1a9 PF: > { %p512_p4 = scmp.ge.s32.totalorder %s610_s27, 2  ;;  %s442_s20 = sand.u32 1, %s598_s24  }
 0x1aa   : > { %s443_s23 = scalar_lea.sflag [#allocation3], %s442_s20 }
 0x1ab   : > { %p509_p7 = pnand %p512_p4, %p694_p6 }
 0x1ad   : > { %p510_p8 = pneg %p509_p7 }
 0x1af   : > { %593 = dma.done.wait (%p510_p8), %s443_s23, 128  }
 0x1b0   : > { %595 = vsyncadd (%p510_p8), %s443_s23, 4294967168  ;;  %p17_p9 = scmp.ge.s32.totalorder %s677_s30, 4   ;;  %s796_s24 = smov %s602_s25 }
 0x1b1   : > { %s797_s25 = smov %s606_s26  ;;  %s798_s26 = smov %s688_s10 }
 0x1b2   : > { %s799_s27 = smov %s677_s30  ;;  %19 = sbr.rel (!%p17_p9) target bundleno = 3 (0x3), region = 83 }
 0x1b7   :  { %449 = vsyncpa [#allocation3], 1 }
 0x1b8   :  { %451 = vsyncpa [#allocation3 + $0x1], 1 }

</bundles_post_ra>
